<compile_context>
chip_gen: v7x
topology: tpu7x:2x2x1
jax: 0.10.0
libtpu: 0.0.40
codegen_flags: <defaults>
</compile_context>

<pallas_src>
import functools

import jax
import jax.numpy as jnp
from jax import lax
from jax.experimental import pallas as pl
from jax.experimental.pallas import tpu as pltpu


# A · Bᵀ via contracting dims ((1,),(1,)) — no explicit .T before the MXU push.
_CONTRACT_LAST = (((1,), (1,)), ((), ()))


def _dsh_loss_kernel(logits_ref, label_ref, out_ref, *,
                     margin, inv_pairs, alpha_over_b):
    logits = logits_ref[...]   # (B, D) native dtype -> MXU (f32 accumulate)
    label = label_ref[...]     # (B, C) bf16 (exact for 0/1 labels)

    # w_label[i, j] = <label_i, label_j>  -> (B, B)
    w_label = lax.dot_general(label, label, dimension_numbers=_CONTRACT_LAST,
                              preferred_element_type=jnp.float32)

    # gram[i, j] = <x_i, x_j>             -> (B, B)
    # Kept at input precision so p_distance[i, i] is exactly zero (matches the
    # f32 reference / PyTorch semantics).
    gram = lax.dot_general(logits, logits, dimension_numbers=_CONTRACT_LAST,
                           preferred_element_type=jnp.float32)

    # Elementwise tail in f32 (v5e VPU/EUP have no bf16 datapath).
    logits_f32 = logits.astype(jnp.float32)
    sq = logits_f32 * logits_f32                                   # (B, D)

    # Row norms: column via lane reduce, row via a tiny MXU product instead of
    # r_col.T (which would lower to an XLU relayout of a (B,1) vector).
    r_col = jnp.sum(sq, axis=1, keepdims=True)                     # (B, 1)
    ones_row = jnp.ones((1, sq.shape[1]), jnp.float32)
    r_row = lax.dot_general(ones_row, sq, dimension_numbers=_CONTRACT_LAST,
                            preferred_element_type=jnp.float32)    # (1, B)

    # p_distance[i, j] = ||x_j||^2 - 2 <x_i, x_j> + ||x_i||^2
    p_distance = r_row - 2.0 * gram + r_col                        # (B, B)

    # temp = w*d + (1-w)*relu(margin - d)  ==  relu + w*(d - relu)
    relu_t = jnp.maximum(margin - p_distance, 0.0)
    temp = relu_t + w_label * (p_distance - relu_t)

    # Fold both reductions: scaled lane-reduced partials, add, one final reduce.
    temp_part = jnp.sum(temp, axis=1, keepdims=True) * inv_pairs   # (B, 1)
    reg_part = jnp.sum(jnp.abs(jnp.abs(logits_f32) - 1.0),
                       axis=1, keepdims=True) * alpha_over_b       # (B, 1)
    out_ref[0, 0] = jnp.sum(temp_part + reg_part)


def dsh_loss(logits, label, *, margin, alpha=0.01):
    """Pallas TPU implementation of DshLoss.forward.

    logits: (B, D) float array (hash logits)
    label:  (B, C) float array ({0,1} one/multi-hot labels)
    returns scalar float32 loss.
    """
    B, D = logits.shape
    _, C = label.shape

    pairs = B * (B - 1)
    # PyTorch divides by zero at runtime for B == 1; here the divide would be a
    # trace-time ZeroDivisionError, so guard the degenerate case explicitly.
    inv_pairs = (1.0 / float(pairs)) if pairs > 0 else float("inf")

    kernel = functools.partial(
        _dsh_loss_kernel,
        margin=float(margin),
        inv_pairs=inv_pairs,
        alpha_over_b=float(alpha) / float(B),
    )

    # bf16 cast is exact for {0,1}-valued labels and halves the label DMA.
    # TODO(synk): keep labels f32 if they can carry arbitrary real values.
    label_bf16 = label.astype(jnp.bfloat16)

    cost = pl.CostEstimate(
        flops=2 * B * B * (D + C) + 2 * B * D + 8 * B * B + 4 * B * D,
        transcendentals=0,
        bytes_accessed=(logits.size * logits.dtype.itemsize
                        + label_bf16.size * label_bf16.dtype.itemsize
                        + 4),
    )

    out = pl.pallas_call(
        kernel,
        out_shape=jax.ShapeDtypeStruct((1, 1), jnp.float32),
        in_specs=[
            pl.BlockSpec(memory_space=pltpu.MemorySpace.VMEM),
            pl.BlockSpec(memory_space=pltpu.MemorySpace.VMEM),
        ],
        out_specs=pl.BlockSpec(memory_space=pltpu.MemorySpace.SMEM),
        cost_estimate=cost,
    )(logits, label_bf16)
    return out[0, 0]


def dsh_loss_ref(logits, label, *, margin, alpha=0.01):
    """Pure-JAX reference (mirrors the PyTorch code exactly)."""
    B = logits.shape[0]
    logits = logits.astype(jnp.float32)
    label = label.astype(jnp.float32)
    w_label = label @ label.T
    r = jnp.sum(logits * logits, axis=1).reshape(1, -1)
    p_distance = r - 2.0 * (logits @ logits.T) + r.T
    temp = w_label * p_distance + (1.0 - w_label) * jax.nn.relu(margin - p_distance)
    regularizer = jnp.sum(jnp.abs(jnp.abs(logits) - 1.0))
    return jnp.sum(temp) / (B * (B - 1)) + alpha * regularizer / B


if __name__ == "__main__":
    key = jax.random.PRNGKey(0)
    k1, k2 = jax.random.split(key)

    B, D, C = 8, 32, 16          # batch, hash-bit dim, num classes
    margin = 2.0 * D             # common DSH choice: 2 * code length

    logits = jax.random.normal(k1, (B, D), dtype=jnp.float32)
    cls = jax.random.randint(k2, (B,), 0, C)
    label = jax.nn.one_hot(cls, C, dtype=jnp.float32)   # one-hot labels

    loss = jax.block_until_ready(dsh_loss(logits, label, margin=margin))
    ref = jax.block_until_ready(dsh_loss_ref(logits, label, margin=margin))
    assert jnp.allclose(loss, ref, rtol=1e-5, atol=1e-5), (loss, ref)

    print("KERNEL_OK")
</pallas_src>

<mosaic_0001>
module attributes {stable_mosaic.version = 11 : i64} {
  func.func @_dsh_loss_kernel(%arg0: memref<8x32xf32, #tpu.memory_space<vmem>>, %arg1: memref<8x16xbf16, #tpu.memory_space<vmem>>, %arg2: memref<1x1xf32, #tpu.memory_space<smem>>) attributes {dimension_semantics = [], scalar_prefetch = 0 : i64, scratch_operands = 0 : i64, tpu.core_type = #tpu.core_type<tc>} {
    %c0 = arith.constant 0 : index
    %c0_0 = arith.constant 0 : index
    %0 = vector.load %arg0[%c0, %c0_0] : memref<8x32xf32, #tpu.memory_space<vmem>>, vector<8x32xf32>
    %c0_1 = arith.constant 0 : index
    %c0_2 = arith.constant 0 : index
    %1 = vector.load %arg1[%c0_1, %c0_2] : memref<8x16xbf16, #tpu.memory_space<vmem>>, vector<8x16xbf16>
    %cst = arith.constant dense<0.000000e+00> : vector<8x8xf32>
    %2 = tpu.matmul %1, %1, %cst {dimension_numbers = #tpu.dot_dimension_numbers<[1], [1], [0], [0], [0, 0, 1, 0], [], []>} : vector<8x16xbf16>, vector<8x16xbf16>, vector<8x8xf32> -> vector<8x8xf32>
    %cst_3 = arith.constant dense<0.000000e+00> : vector<8x8xf32>
    %3 = tpu.matmul %0, %0, %cst_3 {dimension_numbers = #tpu.dot_dimension_numbers<[1], [1], [0], [0], [0, 0, 1, 0], [], []>} : vector<8x32xf32>, vector<8x32xf32>, vector<8x8xf32> -> vector<8x8xf32>
    %4 = arith.mulf %0, %0 : vector<8x32xf32>
    %cst_4 = arith.constant dense<0.000000e+00> : vector<8xf32>
    %5 = vector.multi_reduction <add>, %4, %cst_4 [1] : vector<8x32xf32> to vector<8xf32>
    %6 = vector.shape_cast %5 : vector<8xf32> to vector<8x1xf32>
    %cst_5 = arith.constant 1.000000e+00 : f32
    %7 = vector.broadcast %cst_5 : f32 to vector<1x32xf32>
    %cst_6 = arith.constant dense<0.000000e+00> : vector<1x8xf32>
    %8 = tpu.matmul %7, %4, %cst_6 {dimension_numbers = #tpu.dot_dimension_numbers<[1], [1], [0], [0], [0, 0, 1, 0], [], []>} : vector<1x32xf32>, vector<8x32xf32>, vector<1x8xf32> -> vector<1x8xf32>
    %cst_7 = arith.constant 2.000000e+00 : f32
    %9 = vector.broadcast %cst_7 : f32 to vector<8x8xf32>
    %10 = arith.mulf %9, %3 : vector<8x8xf32>
    %11 = vector.broadcast %8 : vector<1x8xf32> to vector<8x8xf32>
    %12 = arith.subf %11, %10 : vector<8x8xf32>
    %13 = vector.broadcast %6 : vector<8x1xf32> to vector<8x8xf32>
    %14 = arith.addf %12, %13 : vector<8x8xf32>
    %cst_8 = arith.constant 6.400000e+01 : f32
    %15 = vector.broadcast %cst_8 : f32 to vector<8x8xf32>
    %16 = arith.subf %15, %14 : vector<8x8xf32>
    %cst_9 = arith.constant 0.000000e+00 : f32
    %17 = vector.broadcast %cst_9 : f32 to vector<8x8xf32>
    %18 = arith.maximumf %16, %17 : vector<8x8xf32>
    %19 = arith.subf %14, %18 : vector<8x8xf32>
    %20 = arith.mulf %2, %19 : vector<8x8xf32>
    %21 = arith.addf %18, %20 : vector<8x8xf32>
    %cst_10 = arith.constant dense<0.000000e+00> : vector<8xf32>
    %22 = vector.multi_reduction <add>, %21, %cst_10 [1] : vector<8x8xf32> to vector<8xf32>
    %23 = vector.shape_cast %22 : vector<8xf32> to vector<8x1xf32>
    %cst_11 = arith.constant 0.0178571437 : f32
    %24 = vector.broadcast %cst_11 : f32 to vector<8x1xf32>
    %25 = arith.mulf %23, %24 : vector<8x1xf32>
    %26 = math.absf %0 : vector<8x32xf32>
    %cst_12 = arith.constant 1.000000e+00 : f32
    %27 = vector.broadcast %cst_12 : f32 to vector<8x32xf32>
    %28 = arith.subf %26, %27 : vector<8x32xf32>
    %29 = math.absf %28 : vector<8x32xf32>
    %cst_13 = arith.constant dense<0.000000e+00> : vector<8xf32>
    %30 = vector.multi_reduction <add>, %29, %cst_13 [1] : vector<8x32xf32> to vector<8xf32>
    %31 = vector.shape_cast %30 : vector<8xf32> to vector<8x1xf32>
    %cst_14 = arith.constant 1.250000e-03 : f32
    %32 = vector.broadcast %cst_14 : f32 to vector<8x1xf32>
    %33 = arith.mulf %31, %32 : vector<8x1xf32>
    %34 = arith.addf %25, %33 : vector<8x1xf32>
    %35 = vector.shape_cast %34 : vector<8x1xf32> to vector<1x8x1xf32>
    %cst_15 = arith.constant dense<0.000000e+00> : vector<1xf32>
    %36 = vector.multi_reduction <add>, %35, %cst_15 [1, 2] : vector<1x8x1xf32> to vector<1xf32>
    %37 = vector.shape_cast %36 : vector<1xf32> to vector<1x1x1xf32>
    %38 = vector.extract %37[0, 0, 0] : f32 from vector<1x1x1xf32>
    %c0_16 = arith.constant 0 : index
    %c0_17 = arith.constant 0 : index
    %39 = memref.load %arg2[%c0_16, %c0_17] : memref<1x1xf32, #tpu.memory_space<smem>>
    memref.store %38, %arg2[%c0_16, %c0_17] : memref<1x1xf32, #tpu.memory_space<smem>>
    return
  }
}

</mosaic_0001>

<bundles_post_ra>
// kernel: tpu_custom_call.1
= control target key start
LH: loop header
LB: loop body
LE: loop exit
PB: predicated region body
PF: predicated region fallthrough
CT: control target
= control target key end

     0   :  { %7 = vsyncpa [#allocation3], 0  ;;  %s452_s0 = inlined_call_operand.hbm [shape: f32[8,32], index: 0, kind: input, shape index: {}]   ;;  %s453_s1 = inlined_call_operand.hbm [shape: bf16[8,16], index: 1, kind: input, shape index: {}]   ;;  %s454_s2 = inlined_call_operand.hbm [shape: f32[1,1], index: 2, kind: output, shape index: {}]  }
   0x1   :  { %8 = vsyncpa [#allocation6], 0 }
   0x2   :  { %9 = vsyncpa [#allocation4], 0  ;;  %s386_s9 = smov [#allocation2]   ;;  %s387_s11 = smov [#allocation5]  }
   0x3   :  { %s16_s10 = sshll.u32 %s386_s9, 4  ;;  %s26_s12 = sshll.u32 %s387_s11, 4  ;;  %s17_s10 = int_to_ptr.vmem [resolvable:$true] %s16_s10  ;;  %s27_s12 = int_to_ptr.vmem [resolvable:$true] %s26_s12 }
   0x4   :  { %s326_s15 = scalar_lea.hbm %s452_s0, 128 }
   0x5   :  { %p327_p0 = scmp.ne.s32.totalorder %s452_s0, %s326_s15  ;;  %p330_p1 = scmp.lt.u32.totalorder %s326_s15, %s452_s0 }
   0x7   :  { %p332_p2 = pnand %p330_p1, %p327_p0 }
   0x9   :  { %335 = shalt.err (!%p332_p2)
}
   0xa   :  { %s336_s20 = scalar_lea.vmem %s17_s10, 128  ;;  %p341_p4 = scmp.lt.s32.totalorder %s17_s10, %s17_s10 }
   0xb   :  { %p337_p3 = scmp.ne.s32.totalorder %s17_s10, %s336_s20  ;;  %p342_p5 = scmp.lt.s32.totalorder %s336_s20, %s336_s20 }
   0xd   :  { %p343_p6 = por %p342_p5, %p341_p4 }
   0xf   :  { %p344_p7 = pnand %p343_p6, %p337_p3 }
  0x11   :  { %347 = shalt.err (!%p344_p7)
}
  0x12   :  { %19 = dma.hbm_to_vmem [thread:$0]  %s452_s0, 128, %s17_s10, [#allocation3]  }
  0x13   :  { %s348_s25 = scalar_lea.hbm %s453_s1, 64 }
  0x14   :  { %p349_p8 = scmp.ne.s32.totalorder %s453_s1, %s348_s25  ;;  %p352_p9 = scmp.lt.u32.totalorder %s348_s25, %s453_s1 }
  0x16   :  { %p354_p10 = pnand %p352_p9, %p349_p8 }
  0x18   :  { %357 = shalt.err (!%p354_p10)
}
  0x19   :  { %s358_s30 = scalar_lea.vmem %s27_s12, 64  ;;  %p363_p12 = scmp.lt.s32.totalorder %s27_s12, %s27_s12 }
  0x1a   :  { %p359_p11 = scmp.ne.s32.totalorder %s27_s12, %s358_s30  ;;  %p364_p13 = scmp.lt.s32.totalorder %s358_s30, %s358_s30 }
  0x1c   :  { %p365_p0 = por %p364_p13, %p363_p12 }
  0x1e   :  { %p366_p1 = pnand %p365_p0, %p359_p11 }
  0x20   :  { %369 = shalt.err (!%p366_p1)
}
  0x21   :  { %29 = dma.hbm_to_vmem [thread:$0]  %s453_s1, 64, %s27_s12, [#allocation6]  }
  0x22   :  { %380 = dma.done.wait [#allocation3], 128  }
  0x23   :  { %381 = vsyncadd [#allocation3], 4294967168 }
  0x24   :  { %382 = dma.done.wait [#allocation6], 64  }
  0x25   :  { %383 = vsyncadd [#allocation6], 4294967232  ;;  %v388_v0 = vmov 0.0   ;;  %vm389_vm0 = vmmov 0   ;;  %vm83_vm1 = vcmask 261120   ;;  %vm39_vm2 = vcmask 130048  }
  0x26   :  { %308 = vmatprep.subr.mxu1 %v388_v0  ;;  %310 = vmatprep.mubr.msk.f32.mxu1 %vm389_vm0, %v388_v0  ;;  %v37_v1 = vld [vmem:[#allocation2] sm:$0xff]  ;;  %v38_v2 = vld [vmem:[#allocation5] sm:$0xf]  ;;  %v390_v6 = vmov 1.0   ;;  %v238_v11 = vlaneseq  ;;  %vm249_vm3 = vcmask 64512   ;;  %vm262_vm4 = vcmask 7168  }
  0x27   :  { %302 = vmatprep.subr.bf16.mxu0 %v388_v0  ;;  %304 = vmatprep.mubr.msk.bf16.mxu0 %vm389_vm0, %v388_v0  ;;  %v157_v3 = vmul.f32 %v37_v1, %v37_v1  ;;  %v41_v4 = vsel %vm39_vm2, %v38_v2, 0  ;;  %v254_v7 = vand.u32 2147483647, %v37_v1  ;;  %s370_s6 = scalar_lea.hbm %s454_s2, 16 }
  0x28   :  { %309 = vmatpush3.xpose.msk.msra.mxu1 %vm83_vm1, %v37_v1  ;;  %303 = vmatpush3.bf16.xpose.msra.mxu0 %v41_v4  ;;  %v239_v12 = vshrl.u32 %v238_v11, 7  ;;  %p371_p2 = scmp.ne.s32.totalorder %s454_s2, %s370_s6  ;;  %p374_p3 = scmp.lt.u32.totalorder %s370_s6, %s454_s2 }
  0x29   :  { %313 = vmatprep.subr.mxu1 %v388_v0  ;;  %v158_v5 = vsel %vm83_vm1, %v157_v3, 0.0  ;;  %v295_v8 = vadd.f32 -1.0, %v254_v7 }
  0x2a   :  { %159 = vadd.xlane.f32.xlu0 %v158_v5  ;;  %v240_v15 = vsub.s32 0, %v239_v12  ;;  %p376_p4 = pnand %p374_p3, %p371_p2 }
  0x2b   :  { %311 = vmatmul.mubr.msk.f32.vlgmr.msra.gmra.mrb[0].mxu1 %vm83_vm1, %v37_v1  ;;  %v256_v9 = vand.u32 2147483647, %v295_v8 }
  0x2c   :  { %314 = vmatpush3.xpose.msk.msra.mxu1 %vm83_vm1, %v157_v3  ;;  %315 = vmatprep.mubr.msk.f32.mxu1 %vm389_vm0, %v388_v0 }
  0x2d   :  { %v257_v10 = vsel %vm83_vm1, %v256_v9, 0.0 }
  0x2e   :  { %258 = vadd.xlane.f32.xlu1 %v257_v10 }
  0x2f   :  { %316 = vmatmul.mubr.msk.f32.vlgmr.msra.gmra.mrb[2].mxu1 %vm83_vm1, %v390_v6  ;;  %305 = vmatmul.mubr.msk.bf16.vlgmr.msra.gmra.mrb[0].mxu0 %vm39_vm2, %v38_v2 }
  0xb7   :  { %v160_v21 = vpop.xlane.xlu0 %159 }
  0xbb   :  { %v259_v33 = vpop.xlane.xlu1 %258 }
  0xbc   :  { %v260_v34 = vmul.f32 0.00125, %v259_v33 }
  0xfe   :  { %v153_v13 = vpop.f32.mrb[0].mxu1 }
  0xff   :  { %v312_v14 = vpop.f32.mrb[1].mxu1  ;;  %v237_v17 = vmul.f32 2.0, %v153_v13 }
 0x102   :  { %v233_v16 = vpop.f32.mrb[2].mxu1  ;;  %v77_v20 = vpop.f32.mrb[0].mxu0 }
 0x103   :  { %v241_v18 = vrot.slane %v233_v16, %v240_v15  ;;  %v317_v19 = vpop.f32.mrb[3].mxu1  ;;  %v306_v22 = vpop.f32.mrb[1].mxu0 }
 0x104   :  { %v80_v24 = vpop.f32.mrb[2].mxu0 }
 0x105   :  { %v242_v23 = vsub.f32 %v241_v18, %v237_v17  ;;  %v307_v25 = vpop.f32.mrb[3].mxu0 }
 0x107   :  { %v243_v26 = vadd.f32 %v242_v23, %v160_v21 }
 0x109   :  { %v244_v27 = vsub.f32 64.0, %v243_v26 }
 0x10b   :  { %v245_v28 = vmax.f32 %v244_v27, 0.0 }
 0x10d   :  { %v246_v29 = vsub.f32 %v243_v26, %v245_v28 }
 0x10f   :  { %v247_v30 = vmul.f32 %v246_v29, %v77_v20 }
 0x111   :  { %v248_v31 = vadd.f32 %v247_v30, %v245_v28 }
 0x113   :  { %v250_v32 = vsel %vm249_vm3, %v248_v31, 0.0 }
 0x114   :  { %251 = vadd.xlane.f32.xlu0 %v250_v32 }
 0x1a1   :  { %v252_v35 = vpop.xlane.xlu0 %251 }
 0x1a2   :  { %v253_v36 = vmul.f32 0.017857144, %v252_v35 }
 0x1a4   :  { %v261_v37 = vadd.f32 %v260_v34, %v253_v36 }
 0x1a6   :  { %v263_v38 = vsel %vm262_vm4, %v261_v37, 0.0 }
 0x1a7   :  { %264 = vadd.xlane.f32.xlu1 %v263_v38 }
 0x234   :  { %v265_v39 = vpop.xlane.xlu1 %264 }
 0x235   :  { %v266_v40 = vrot.slane %v265_v39, 4 }
 0x237   :  { %v267_v41 = vadd.f32 %v266_v40, %v265_v39 }
 0x239   :  { %v268_v42 = vrot.slane %v267_v41, 2 }
 0x23b   :  { %v269_v43 = vadd.f32 %v268_v42, %v267_v41 }
 0x23d   :  { %v270_v44 = vrot.slane %v269_v43, 1 }
 0x23f   :  { %v271_v45 = vadd.f32 %v270_v44, %v269_v43 }
 0x241   :  { %318 = vpush %v271_v45 }
 0x272   :  { %s319_s1 = spop %318 }
 0x273   :  { %274 = sst [smem:[#allocation7]] %s319_s1 }
 0x274   :  { %379 = shalt.err (!%p376_p4)
}
 0x275   :  { %s391_s11 = smov [#allocation7]  }
 0x276   :  { %282 = dma.smem_to_hbm %s391_s11, 16, %s454_s2, [#allocation4]  }
 0x277   :  { %384 = dma.done.wait [#allocation4], 16  }
 0x278   :  { %385 = vsyncadd [#allocation4], 4294967280 }
 0x279   :  { %286 = sfence }
 0x27a   :  { %287 = vsyncpa [#allocation3], 1 }
 0x27b   :  { %288 = vsyncpa [#allocation6], 1 }
 0x27c   :  { %289 = vsyncpa [#allocation4], 1 }

</bundles_post_ra>
